<compile_context>
chip_gen: v5e
topology: v5e:2x2
jax: 0.10.0
libtpu: 0.0.40
codegen_flags: <defaults>
</compile_context>

<pallas_src>
import functools

import jax
import jax.numpy as jnp
from jax.experimental import pallas as pl
from jax.experimental.pallas import tpu as pltpu

BN_EPS = 1e-5


# ----------------------------- Pallas kernel ------------------------------- #

def _encoder_fused_kernel(x_ref, eps_ref,
                          wmod_ref, amod_ref, bmod_ref,
                          wenc_ref, aenc_ref, benc_ref,
                          wmv_ref, bmv_ref,
                          out_ref, mu_ref, lv_ref, *, z_dim):
    """Full encoder forward for one batch tile, everything resident in VMEM."""
    x = x_ref[...]                                              # (tb, F_total)

    # per-modality Linear (block-diag weight, inw folded) -> ReLU -> BN
    h = jnp.dot(x, wmod_ref[...], preferred_element_type=jnp.float32)
    h = jnp.maximum(h, 0.0) * amod_ref[...] + bmod_ref[...]     # (tb, H_total)

    # encoder: Linear -> ReLU -> BN
    z = jnp.dot(h, wenc_ref[...], preferred_element_type=jnp.float32)
    z = jnp.maximum(z, 0.0) * aenc_ref[...] + benc_ref[...]     # (tb, z_dim)

    # fc_mu | fc_var merged into one matmul (BN scale folded into weight)
    mv = jnp.dot(z, wmv_ref[...], preferred_element_type=jnp.float32)
    mv = mv + bmv_ref[...]                                      # (tb, 2*z_dim)
    mu = mv[:, :z_dim]
    lv = mv[:, z_dim:]

    mu_ref[...] = mu
    lv_ref[...] = lv
    # reparameterize: eps * exp(0.5*lv) + mu  (EUP exp + VPU FMA, same kernel)
    out_ref[...] = eps_ref[...] * jnp.exp(0.5 * lv) + mu


# ----------------------------- parameter setup ----------------------------- #

def _bn_fold(n_out):
    # Fresh nn.BatchNorm1d: gamma=1, beta=0, running_mean=0, running_var=1.
    gamma = jnp.ones((n_out,), jnp.float32)
    beta = jnp.zeros((n_out,), jnp.float32)
    mean = jnp.zeros((n_out,), jnp.float32)
    var = jnp.ones((n_out,), jnp.float32)
    a = gamma / jnp.sqrt(var + BN_EPS)
    b = beta - mean * a
    return a.reshape(1, -1), b.reshape(1, -1)


def _init_linear(key, n_in, n_out):
    # PyTorch nn.Linear default init: U(-1/sqrt(n_in), 1/sqrt(n_in)),
    # stored transposed as (n_in, n_out) so the kernel computes x @ W.
    bound = 1.0 / jnp.sqrt(jnp.asarray(n_in, jnp.float32))
    return jax.random.uniform(key, (n_in, n_out), jnp.float32, -bound, bound)


def init_encoder_params(key, num_features, num_hidden, z_dim):
    n_mod = len(num_features)
    keys = jax.random.split(key, 2 * n_mod + 3)
    ki = iter(keys)

    f_total = sum(num_features)
    h_total = sum(num_hidden)

    # Block-diagonal modality weight with inw folded in (exact).
    w_modal = jnp.zeros((f_total, h_total), jnp.float32)
    a_list, b_list = [], []
    r = c = 0
    for i in range(n_mod):
        nf, nh = num_features[i], num_hidden[i]
        w_i = _init_linear(next(ki), nf, nh)
        inw = jax.random.uniform(next(ki), (1, nf), jnp.float32) * 0.001
        w_modal = w_modal.at[r:r + nf, c:c + nh].set(inw.reshape(-1, 1) * w_i)
        a_i, b_i = _bn_fold(nh)
        a_list.append(a_i)
        b_list.append(b_i)
        r += nf
        c += nh
    a_modal = jnp.concatenate(a_list, axis=1)
    b_modal = jnp.concatenate(b_list, axis=1)

    w_enc = _init_linear(next(ki), h_total, z_dim)
    a_enc, b_enc = _bn_fold(z_dim)

    # fc_mu / fc_var: no ReLU before BN -> BN scale folds exactly into W.
    w_mu = _init_linear(next(ki), z_dim, z_dim)
    a_mu, b_mu = _bn_fold(z_dim)
    w_var = _init_linear(next(ki), z_dim, z_dim)
    a_var, b_var = _bn_fold(z_dim)
    w_mv = jnp.concatenate([w_mu * a_mu, w_var * a_var], axis=1)  # (z, 2z)
    b_mv = jnp.concatenate([b_mu, b_var], axis=1)                 # (1, 2z)

    return dict(W_modal=w_modal, a_modal=a_modal, b_modal=b_modal,
                W_enc=w_enc, a_enc=a_enc, b_enc=b_enc,
                W_mv=w_mv, b_mv=b_mv, z_dim=z_dim)


# ------------------------------ forward pass ------------------------------- #

def encoder_forward(params, x, eps, *, batch_tile=256):
    batch, f_total = x.shape
    z_dim = params["z_dim"]

    # Batch tiling (lets large batches pipeline / shard across TCs);
    # degenerates to a single full-batch tile for tiny batches.
    tb = min(batch_tile, batch)
    if batch % tb != 0 or (tb != batch and tb % 8 != 0):
        tb = batch
    grid = (batch // tb,)

    def rows(cols):
        return pl.BlockSpec((tb, cols), lambda i: (i, 0))

    def whole(arr):
        return pl.BlockSpec(arr.shape, lambda i, _nd=arr.ndim: (0,) * _nd)

    kernel = functools.partial(_encoder_fused_kernel, z_dim=z_dim)
    out, mu, lv = pl.pallas_call(
        kernel,
        out_shape=(jax.ShapeDtypeStruct((batch, z_dim), jnp.float32),) * 3,
        grid=grid,
        in_specs=[
            rows(f_total),                 # x
            rows(z_dim),                   # eps
            whole(params["W_modal"]), whole(params["a_modal"]), whole(params["b_modal"]),
            whole(params["W_enc"]), whole(params["a_enc"]), whole(params["b_enc"]),
            whole(params["W_mv"]), whole(params["b_mv"]),
        ],
        out_specs=(rows(z_dim), rows(z_dim), rows(z_dim)),
        compiler_params=pltpu.CompilerParams(
            dimension_semantics=("parallel",)),
    )(x, eps,
      params["W_modal"], params["a_modal"], params["b_modal"],
      params["W_enc"], params["a_enc"], params["b_enc"],
      params["W_mv"], params["b_mv"])
    return out, mu, lv


def encoder_reference(params, x, eps):
    """Pure-JAX reference (same folded-parameter math) for validation."""
    hi = jax.lax.Precision.HIGHEST
    z_dim = params["z_dim"]
    h = jnp.maximum(jnp.dot(x, params["W_modal"], precision=hi), 0.0)
    h = h * params["a_modal"] + params["b_modal"]
    z = jnp.maximum(jnp.dot(h, params["W_enc"], precision=hi), 0.0)
    z = z * params["a_enc"] + params["b_enc"]
    mv = jnp.dot(z, params["W_mv"], precision=hi) + params["b_mv"]
    mu, lv = mv[:, :z_dim], mv[:, z_dim:]
    return eps * jnp.exp(0.5 * lv) + mu, mu, lv


# ---------------------------------- main ----------------------------------- #

if __name__ == "__main__":
    num_features = [16, 12]        # two modalities
    num_hidden = [32, 24]
    z_dim = 32
    batch = 8

    key = jax.random.PRNGKey(0)
    k_param, k_x, k_eps = jax.random.split(key, 3)

    params = init_encoder_params(k_param, num_features, num_hidden, z_dim)
    x = jax.random.normal(k_x, (batch, sum(num_features)), jnp.float32)
    eps = jax.random.normal(k_eps, (batch, z_dim), jnp.float32)  # randn_like(std)

    z, mu, logvar = encoder_forward(params, x, eps)
    jax.block_until_ready((z, mu, logvar))

    z_r, mu_r, lv_r = encoder_reference(params, x, eps)
    assert z.shape == (batch, z_dim) and mu.shape == (batch, z_dim) and logvar.shape == (batch, z_dim)
    assert jnp.allclose(mu, mu_r, atol=1e-3, rtol=1e-3)
    assert jnp.allclose(logvar, lv_r, atol=1e-3, rtol=1e-3)
    assert jnp.allclose(z, z_r, atol=1e-3, rtol=1e-3)
    print("KERNEL_OK")
</pallas_src>

<mosaic_0001>
module attributes {stable_mosaic.version = 11 : i64} {
  func.func @_encoder_fused_kernel(%arg0: i32, %arg1: memref<8x28xf32, #tpu.memory_space<vmem>>, %arg2: memref<8x32xf32, #tpu.memory_space<vmem>>, %arg3: memref<28x56xf32, #tpu.memory_space<vmem>>, %arg4: memref<1x56xf32, #tpu.memory_space<vmem>>, %arg5: memref<1x56xf32, #tpu.memory_space<vmem>>, %arg6: memref<56x32xf32, #tpu.memory_space<vmem>>, %arg7: memref<1x32xf32, #tpu.memory_space<vmem>>, %arg8: memref<1x32xf32, #tpu.memory_space<vmem>>, %arg9: memref<32x64xf32, #tpu.memory_space<vmem>>, %arg10: memref<1x64xf32, #tpu.memory_space<vmem>>, %arg11: memref<8x32xf32, #tpu.memory_space<vmem>>, %arg12: memref<8x32xf32, #tpu.memory_space<vmem>>, %arg13: memref<8x32xf32, #tpu.memory_space<vmem>>) attributes {dimension_semantics = [#tpu.dimension_semantics<parallel>], iteration_bounds = array<i64: 1>, scalar_prefetch = 0 : i64, scratch_operands = 0 : i64, tpu.core_type = #tpu.core_type<tc>, window_params = [{transform_indices = @transform_0, window_bounds = array<i64: 8, 28>}, {transform_indices = @transform_1, window_bounds = array<i64: 8, 32>}, {pipeline_mode = #tpu.pipeline_mode<synchronous>, transform_indices = @transform_2, window_bounds = array<i64: 28, 56>}, {pipeline_mode = #tpu.pipeline_mode<synchronous>, transform_indices = @transform_3, window_bounds = array<i64: 1, 56>}, {pipeline_mode = #tpu.pipeline_mode<synchronous>, transform_indices = @transform_4, window_bounds = array<i64: 1, 56>}, {pipeline_mode = #tpu.pipeline_mode<synchronous>, transform_indices = @transform_5, window_bounds = array<i64: 56, 32>}, {pipeline_mode = #tpu.pipeline_mode<synchronous>, transform_indices = @transform_6, window_bounds = array<i64: 1, 32>}, {pipeline_mode = #tpu.pipeline_mode<synchronous>, transform_indices = @transform_7, window_bounds = array<i64: 1, 32>}, {pipeline_mode = #tpu.pipeline_mode<synchronous>, transform_indices = @transform_8, window_bounds = array<i64: 32, 64>}, {pipeline_mode = #tpu.pipeline_mode<synchronous>, transform_indices = @transform_9, window_bounds = array<i64: 1, 64>}, {transform_indices = @transform_10, window_bounds = array<i64: 8, 32>}, {transform_indices = @transform_11, window_bounds = array<i64: 8, 32>}, {transform_indices = @transform_12, window_bounds = array<i64: 8, 32>}]} {
    %c0 = arith.constant 0 : index
    %c0_0 = arith.constant 0 : index
    %0 = vector.load %arg1[%c0, %c0_0] : memref<8x28xf32, #tpu.memory_space<vmem>>, vector<8x28xf32>
    %c0_1 = arith.constant 0 : index
    %c0_2 = arith.constant 0 : index
    %1 = vector.load %arg3[%c0_1, %c0_2] : memref<28x56xf32, #tpu.memory_space<vmem>>, vector<28x56xf32>
    %cst = arith.constant dense<0.000000e+00> : vector<8x56xf32>
    %2 = tpu.matmul %0, %1, %cst {dimension_numbers = #tpu.dot_dimension_numbers<[1], [0], [0], [1], [0, 0, 1, 1], [], []>} : vector<8x28xf32>, vector<28x56xf32>, vector<8x56xf32> -> vector<8x56xf32>
    %cst_3 = arith.constant 0.000000e+00 : f32
    %3 = vector.broadcast %cst_3 : f32 to vector<8x56xf32>
    %4 = arith.maximumf %2, %3 : vector<8x56xf32>
    %c0_4 = arith.constant 0 : index
    %c0_5 = arith.constant 0 : index
    %5 = vector.load %arg4[%c0_4, %c0_5] : memref<1x56xf32, #tpu.memory_space<vmem>>, vector<1x56xf32>
    %6 = vector.broadcast %5 : vector<1x56xf32> to vector<8x56xf32>
    %7 = arith.mulf %4, %6 : vector<8x56xf32>
    %c0_6 = arith.constant 0 : index
    %c0_7 = arith.constant 0 : index
    %8 = vector.load %arg5[%c0_6, %c0_7] : memref<1x56xf32, #tpu.memory_space<vmem>>, vector<1x56xf32>
    %9 = vector.broadcast %8 : vector<1x56xf32> to vector<8x56xf32>
    %10 = arith.addf %7, %9 : vector<8x56xf32>
    %c0_8 = arith.constant 0 : index
    %c0_9 = arith.constant 0 : index
    %11 = vector.load %arg6[%c0_8, %c0_9] : memref<56x32xf32, #tpu.memory_space<vmem>>, vector<56x32xf32>
    %cst_10 = arith.constant dense<0.000000e+00> : vector<8x32xf32>
    %12 = tpu.matmul %10, %11, %cst_10 {dimension_numbers = #tpu.dot_dimension_numbers<[1], [0], [0], [1], [0, 0, 1, 1], [], []>} : vector<8x56xf32>, vector<56x32xf32>, vector<8x32xf32> -> vector<8x32xf32>
    %cst_11 = arith.constant 0.000000e+00 : f32
    %13 = vector.broadcast %cst_11 : f32 to vector<8x32xf32>
    %14 = arith.maximumf %12, %13 : vector<8x32xf32>
    %c0_12 = arith.constant 0 : index
    %c0_13 = arith.constant 0 : index
    %15 = vector.load %arg7[%c0_12, %c0_13] : memref<1x32xf32, #tpu.memory_space<vmem>>, vector<1x32xf32>
    %16 = vector.broadcast %15 : vector<1x32xf32> to vector<8x32xf32>
    %17 = arith.mulf %14, %16 : vector<8x32xf32>
    %c0_14 = arith.constant 0 : index
    %c0_15 = arith.constant 0 : index
    %18 = vector.load %arg8[%c0_14, %c0_15] : memref<1x32xf32, #tpu.memory_space<vmem>>, vector<1x32xf32>
    %19 = vector.broadcast %18 : vector<1x32xf32> to vector<8x32xf32>
    %20 = arith.addf %17, %19 : vector<8x32xf32>
    %c0_16 = arith.constant 0 : index
    %c0_17 = arith.constant 0 : index
    %21 = vector.load %arg9[%c0_16, %c0_17] : memref<32x64xf32, #tpu.memory_space<vmem>>, vector<32x64xf32>
    %cst_18 = arith.constant dense<0.000000e+00> : vector<8x64xf32>
    %22 = tpu.matmul %20, %21, %cst_18 {dimension_numbers = #tpu.dot_dimension_numbers<[1], [0], [0], [1], [0, 0, 1, 1], [], []>} : vector<8x32xf32>, vector<32x64xf32>, vector<8x64xf32> -> vector<8x64xf32>
    %c0_19 = arith.constant 0 : index
    %c0_20 = arith.constant 0 : index
    %23 = vector.load %arg10[%c0_19, %c0_20] : memref<1x64xf32, #tpu.memory_space<vmem>>, vector<1x64xf32>
    %24 = vector.broadcast %23 : vector<1x64xf32> to vector<8x64xf32>
    %25 = arith.addf %22, %24 : vector<8x64xf32>
    %26 = vector.extract_strided_slice %25 {offsets = [0, 0], sizes = [8, 32], strides = [1, 1]} : vector<8x64xf32> to vector<8x32xf32>
    %27 = vector.extract_strided_slice %25 {offsets = [0, 32], sizes = [8, 32], strides = [1, 1]} : vector<8x64xf32> to vector<8x32xf32>
    %c0_21 = arith.constant 0 : index
    %c0_22 = arith.constant 0 : index
    %28 = vector.load %arg12[%c0_21, %c0_22] : memref<8x32xf32, #tpu.memory_space<vmem>>, vector<8x32xf32>
    tpu.vector_store %arg12[%c0_21, %c0_22], %26 {strides = array<i32>} : memref<8x32xf32, #tpu.memory_space<vmem>>, vector<8x32xf32>,
    %c0_23 = arith.constant 0 : index
    %c0_24 = arith.constant 0 : index
    %29 = vector.load %arg13[%c0_23, %c0_24] : memref<8x32xf32, #tpu.memory_space<vmem>>, vector<8x32xf32>
    tpu.vector_store %arg13[%c0_23, %c0_24], %27 {strides = array<i32>} : memref<8x32xf32, #tpu.memory_space<vmem>>, vector<8x32xf32>,
    %c0_25 = arith.constant 0 : index
    %c0_26 = arith.constant 0 : index
    %30 = vector.load %arg2[%c0_25, %c0_26] : memref<8x32xf32, #tpu.memory_space<vmem>>, vector<8x32xf32>
    %cst_27 = arith.constant 5.000000e-01 : f32
    %31 = vector.broadcast %cst_27 : f32 to vector<8x32xf32>
    %32 = arith.mulf %31, %27 : vector<8x32xf32>
    %33 = math.exp %32 : vector<8x32xf32>
    %34 = arith.mulf %30, %33 : vector<8x32xf32>
    %35 = arith.addf %34, %26 : vector<8x32xf32>
    %c0_28 = arith.constant 0 : index
    %c0_29 = arith.constant 0 : index
    %36 = vector.load %arg11[%c0_28, %c0_29] : memref<8x32xf32, #tpu.memory_space<vmem>>, vector<8x32xf32>
    tpu.vector_store %arg11[%c0_28, %c0_29], %35 {strides = array<i32>} : memref<8x32xf32, #tpu.memory_space<vmem>>, vector<8x32xf32>,
    return
  }
  func.func @transform_0(%arg0: i32) -> (i32, i32) {
    %c0_i32 = arith.constant 0 : i32
    %c0_i32_0 = arith.constant 0 : i32
    return %arg0, %c0_i32 : i32, i32
  }
  func.func @transform_1(%arg0: i32) -> (i32, i32) {
    %c0_i32 = arith.constant 0 : i32
    %c0_i32_0 = arith.constant 0 : i32
    return %arg0, %c0_i32 : i32, i32
  }
  func.func @transform_2(%arg0: i32) -> (i32, i32) {
    %c0_i32 = arith.constant 0 : i32
    %c0_i32_0 = arith.constant 0 : i32
    %c0_i32_1 = arith.constant 0 : i32
    return %c0_i32, %c0_i32_0 : i32, i32
  }
  func.func @transform_3(%arg0: i32) -> (i32, i32) {
    %c0_i32 = arith.constant 0 : i32
    %c0_i32_0 = arith.constant 0 : i32
    %c0_i32_1 = arith.constant 0 : i32
    return %c0_i32, %c0_i32_0 : i32, i32
  }
  func.func @transform_4(%arg0: i32) -> (i32, i32) {
    %c0_i32 = arith.constant 0 : i32
    %c0_i32_0 = arith.constant 0 : i32
    %c0_i32_1 = arith.constant 0 : i32
    return %c0_i32, %c0_i32_0 : i32, i32
  }
  func.func @transform_5(%arg0: i32) -> (i32, i32) {
    %c0_i32 = arith.constant 0 : i32
    %c0_i32_0 = arith.constant 0 : i32
    %c0_i32_1 = arith.constant 0 : i32
    return %c0_i32, %c0_i32_0 : i32, i32
  }
  func.func @transform_6(%arg0: i32) -> (i32, i32) {
    %c0_i32 = arith.constant 0 : i32
    %c0_i32_0 = arith.constant 0 : i32
    %c0_i32_1 = arith.constant 0 : i32
    return %c0_i32, %c0_i32_0 : i32, i32
  }
  func.func @transform_7(%arg0: i32) -> (i32, i32) {
    %c0_i32 = arith.constant 0 : i32
    %c0_i32_0 = arith.constant 0 : i32
    %c0_i32_1 = arith.constant 0 : i32
    return %c0_i32, %c0_i32_0 : i32, i32
  }
  func.func @transform_8(%arg0: i32) -> (i32, i32) {
    %c0_i32 = arith.constant 0 : i32
    %c0_i32_0 = arith.constant 0 : i32
    %c0_i32_1 = arith.constant 0 : i32
    return %c0_i32, %c0_i32_0 : i32, i32
  }
  func.func @transform_9(%arg0: i32) -> (i32, i32) {
    %c0_i32 = arith.constant 0 : i32
    %c0_i32_0 = arith.constant 0 : i32
    %c0_i32_1 = arith.constant 0 : i32
    return %c0_i32, %c0_i32_0 : i32, i32
  }
  func.func @transform_10(%arg0: i32) -> (i32, i32) {
    %c0_i32 = arith.constant 0 : i32
    %c0_i32_0 = arith.constant 0 : i32
    return %arg0, %c0_i32 : i32, i32
  }
  func.func @transform_11(%arg0: i32) -> (i32, i32) {
    %c0_i32 = arith.constant 0 : i32
    %c0_i32_0 = arith.constant 0 : i32
    return %arg0, %c0_i32 : i32, i32
  }
  func.func @transform_12(%arg0: i32) -> (i32, i32) {
    %c0_i32 = arith.constant 0 : i32
    %c0_i32_0 = arith.constant 0 : i32
    return %arg0, %c0_i32 : i32, i32
  }
}

</mosaic_0001>

<bundles_post_ra>
// kernel: tpu_custom_call.1
= control target key start
LH: loop header
LB: loop body
LE: loop exit
PB: predicated region body
PF: predicated region fallthrough
CT: control target
= control target key end

     0   :  { %18 = vsyncpa [#allocation3], 0  ;;  %vm49_vm0 = vcmask 1043456   ;;  %s461_s0 = inlined_call_operand.vmem [shape: f32[8,28], index: 0, kind: input, shape index: {}]   ;;  %s462_s1 = inlined_call_operand.vmem [shape: f32[8,32], index: 1, kind: input, shape index: {}]   ;;  %s463_s2 = inlined_call_operand.vmem [shape: f32[28,56], index: 2, kind: input, shape index: {}]   ;;  %s464_s3 = inlined_call_operand.vmem [shape: f32[1,56], index: 3, kind: input, shape index: {}]   ;;  %s465_s4 = inlined_call_operand.vmem [shape: f32[1,56], index: 4, kind: input, shape index: {}]   ;;  %s466_s5 = inlined_call_operand.vmem [shape: f32[56,32], index: 5, kind: input, shape index: {}]   ;;  %s467_s6 = inlined_call_operand.vmem [shape: f32[1,32], index: 6, kind: input, shape index: {}]   ;;  %s468_s7 = inlined_call_operand.vmem [shape: f32[1,32], index: 7, kind: input, shape index: {}]   ;;  %s469_s8 = inlined_call_operand.vmem [shape: f32[32,64], index: 8, kind: input, shape index: {}]   ;;  %s470_s9 = inlined_call_operand.vmem [shape: f32[1,64], index: 9, kind: input, shape index: {}]   ;;  %s471_s10 = inlined_call_operand.hbm [shape: f32[8,32], index: 10, kind: output, shape index: {0}]   ;;  %s472_s11 = inlined_call_operand.hbm [shape: f32[8,32], index: 11, kind: output, shape index: {1}]   ;;  %s473_s12 = inlined_call_operand.hbm [shape: f32[8,32], index: 12, kind: output, shape index: {2}]  }
   0x1   :  { %v44_v0 = vld [vmem:[%s463_s2 + $0x18] sm:$0xf]  ;;  %v43_v1 = vld [vmem:[%s463_s2 + $0x10] sm:$0xff]  ;;  %v42_v2 = vld [vmem:[%s463_s2 + $0x8] sm:$0xff] }
   0x2   :  { %222 = vmatpush.msk.msra.mxu0 %vm49_vm0, %v44_v0  ;;  %v90_v3 = vld [vmem:[%s466_s5 + $0x30] sm:$0xff]  ;;  %v89_v4 = vld [vmem:[%s466_s5 + $0x28] sm:$0xff]  ;;  %v88_v5 = vld [vmem:[%s466_s5 + $0x20] sm:$0xff] }
   0x3   :  { %104 = vmatpush.msra.mxu1 %v90_v3  ;;  %v41_v6 = vld [vmem:[%s463_s2] sm:$0xff] }
   0x4   :  { %66 = vmatpush.msra.mxu0 %v43_v1 }
   0x5   :  { %105 = vmatpush.msra.mxu1 %v89_v4 }
   0x6   :  { %19 = vsyncpa [#allocation5], 0  ;;  %67 = vmatpush.msra.mxu0 %v42_v2  ;;  %v40_v7 = vld [vmem:[%s461_s0] sm:$0xff]  ;;  %vm45_vm1 = vcmask 228352   ;;  %v87_v8 = vld [vmem:[%s466_s5 + $0x18] sm:$0xff]  ;;  %vm91_vm2 = vcmask 457728  }
   0x7   :  { %106 = vmatpush.msra.mxu1 %v88_v5  ;;  %v86_v9 = vld [vmem:[%s466_s5 + $0x10] sm:$0xff]  ;;  %v85_v10 = vld [vmem:[%s466_s5 + $0x8] sm:$0xff]  ;;  %v84_v11 = vld [vmem:[%s466_s5] sm:$0xff]  ;;  %vm134_vm3 = vcmask 261120   ;;  %s193_s2 = sshll.u32 %s472_s11, 4  ;;  %s314_s23 = smov 96   ;;  %s194_s2 = int_to_ptr.hbm [resolvable:$true] %s193_s2 }
   0x8   :  { %68 = vmatpush.msra.mxu0 %v41_v6  ;;  %v230_v12 = vld [vmem:[%s464_s3] ss:$0 sm:$0xff]  ;;  %v129_v18 = vld [vmem:[%s469_s8 + $0x18] sm:$0xff]  ;;  %v128_v19 = vld [vmem:[%s469_s8 + $0x10] sm:$0xff]  ;;  %s315_s24 = smov [#allocation2]   ;;  %s182_s28 = sshll.u32 %s471_s10, 4  ;;  %s183_s28 = int_to_ptr.hbm [resolvable:$true] %s182_s28 }
   0x9   :  { %223 = vmatmul.msk.f32.vlgmr.msra.gmra.mxu0 %vm45_vm1, %v40_v7  ;;  %107 = vmatpush.msra.mxu1 %v87_v8  ;;  %v231_v15 = vld [vmem:[%s465_s4] ss:$0 sm:$0xff]  ;;  %v127_v20 = vld [vmem:[%s469_s8 + $0x8] sm:$0xff]  ;;  %s180_s25 = sshll.u32 %s315_s24, 4  ;;  %s316_s11 = smov [#allocation6]   ;;  %s181_s25 = int_to_ptr.vmem [resolvable:$true] %s180_s25 }
   0xa   :  { %150 = vmatpush.msra.mxu2 %v129_v18  ;;  %v126_v21 = vld [vmem:[%s469_s8] sm:$0xff]  ;;  %s202_s29 = sshll.u32 %s316_s11, 4  ;;  %s204_s13 = sshll.u32 %s473_s12, 4  ;;  %s203_s29 = int_to_ptr.vmem [resolvable:$true] %s202_s29  ;;  %s205_s13 = int_to_ptr.hbm [resolvable:$true] %s204_s13 }
   0xb   :  { %108 = vmatpush.msra.mxu1 %v86_v9  ;;  %v232_v22 = vld [vmem:[%s467_s6] ss:$0 sm:$0xff]  ;;  %s313_s6 = smov [#allocation4]  }
   0xc   :  { %151 = vmatpush.msra.mxu2 %v128_v19  ;;  %v233_v25 = vld [vmem:[%s468_s7] ss:$0 sm:$0xff]  ;;  %s191_s8 = sshll.u32 %s313_s6, 4  ;;  %s192_s8 = int_to_ptr.vmem [resolvable:$true] %s191_s8 }
   0xd   :  { %109 = vmatpush.msra.mxu1 %v85_v10  ;;  %v234_v28 = vld [vmem:[%s470_s9] ss:$0 sm:$0xff] }
   0xe   :  { %152 = vmatpush.msra.mxu2 %v127_v20  ;;  %v164_v34 = vld [vmem:[%s462_s1] sm:$0xff] }
   0xf   :  { %110 = vmatpush.msra.mxu1 %v84_v11 }
  0x10   :  { %153 = vmatpush.msra.mxu2 %v126_v21 }
  0x86   :  { %v70_v13 = vpop.f32.mrf.mxu0 }
  0x87   :  { %v73_v14 = vmax.f32 %v70_v13, 0.0 }
  0x89   :  { %v78_v16 = vmul.f32 %v230_v12, %v73_v14 }
  0x8b   :  { %v83_v17 = vadd.f32 %v231_v15, %v78_v16 }
  0x8d   :  { %224 = vmatmul.msk.f32.vlgmr.msra.gmra.mxu1 %vm91_vm2, %v83_v17 }
 0x10a   :  { %v112_v23 = vpop.f32.mrf.mxu1 }
 0x10b   :  { %v115_v24 = vmax.f32 %v112_v23, 0.0 }
 0x10d   :  { %v120_v26 = vmul.f32 %v232_v22, %v115_v24 }
 0x10f   :  { %v125_v27 = vadd.f32 %v233_v25, %v120_v26 }
 0x111   :  { %225 = vmatmul.msk.f32.vlgmr.msra.gmra.mxu2 %vm134_vm3, %v125_v27 }
 0x194   :  { %v155_v29 = vpop.f32.mrf.mxu2 }
 0x195   :  { %v156_v30 = vadd.f32 %v234_v28, %v155_v29 }
 0x197   :  { %158 = vst.msk [vmem:[#allocation4] sm:$0xff] %vm134_vm3, %v156_v30  ;;  %v165_v31 = vmul.f32 0.5, %v156_v30 }
 0x198   :  { %196 = dma.vmem_to_hbm [thread:$0]  %s192_s8, 128, %s194_s2, [#allocation5]  }
 0x199   :  { %v166_v32 = vmul.f32 1.442695, %v165_v31 }
 0x19b   :  { %235 = vpow2.f32 %v166_v32 }
 0x1a1   :  { %v236_v33 = vpop.eup %235 }
 0x1a2   :  { %169 = vrot.lane.b32.xlu0 %v236_v33, %s314_s23 }
 0x1aa   :  { %160 = vrot.lane.b32.xlu0 %v156_v30, %s314_s23 }
 0x214   :  { %v170_v35 = vpop.permute.xlu0 %169 }
 0x215   :  { %v172_v36 = vmul.f32 %v170_v35, %v164_v34 }
 0x217   :  { %v173_v37 = vadd.f32 %v172_v36, %v156_v30 }
 0x219   :  { %174 = vst.msk [vmem:[#allocation2] sm:$0xff] %vm134_vm3, %v173_v37 }
 0x21a   :  { %185 = dma.vmem_to_hbm [thread:$0]  %s181_s25, 128, %s183_s28, [#allocation3]  }
 0x21c   :  { %v161_v38 = vpop.permute.xlu0 %160 }
 0x21d   :  { %163 = vst.msk [vmem:[#allocation6] sm:$0xff] %vm134_vm3, %v161_v38 }
 0x21e   :  { %207 = dma.vmem_to_hbm [thread:$0]  %s203_s29, 128, %s205_s13, [#allocation5]  }
 0x21f   :  { %309 = dma.done.wait [#allocation3], 128  }
 0x220   :  { %310 = vsyncadd [#allocation3], 4294967168 }
 0x221   :  { %311 = dma.done.wait [#allocation5], 256  }
 0x222   :  { %312 = vsyncadd [#allocation5], 4294967040 }
 0x223   :  { %220 = vsyncpa [#allocation3], 1 }
 0x224   :  { %221 = vsyncpa [#allocation5], 1 }

</bundles_post_ra>
